<compile_context>
chip_gen: v5e
topology: v5e:2x2
jax: 0.10.0
libtpu: 0.0.40
codegen_flags: <defaults>
</compile_context>

<pallas_src>
import functools
import math

import jax
import jax.numpy as jnp
from jax import lax
from jax.experimental import pallas as pl
from jax.experimental.pallas import tpu as pltpu


# ----------------------------------------------------------------------------- kernels


def _kcache_kernel(xq_ref, xk_ref, wqt_ref, wkt_ref, bq_ref, bk_ref,
                   o_ref, q_scratch, k_scratch, *, scale, tk):
    # xq_ref: (tq, D) x rows for this query tile
    # xk_ref: (S, D)  full x rows for this bh (block index only depends on bh)
    # wqt/wkt: (D, D) transposed Linear weights (y = x @ W.T + b)
    # bq/bk:  (1, D)  f32
    # o_ref:  (tq, tk) score tile
    # q_scratch: (tq, D) in x.dtype, persists across the ki sweep
    # k_scratch: (S, D)  in x.dtype, persists across the (qi, ki) sweep of this bh
    qi = pl.program_id(1)
    ki = pl.program_id(2)

    # Project the full K (+bias) once per bh.
    @pl.when(jnp.logical_and(qi == 0, ki == 0))
    def _():
        k = jnp.dot(xk_ref[...], wkt_ref[...], preferred_element_type=jnp.float32)
        k_scratch[...] = (k + bk_ref[...]).astype(k_scratch.dtype)

    # Project + pre-scale the Q tile once per (bh, qi); fold 1/sqrt(D) into the small
    # (tq, D) tile instead of the (tq, tk) score tile.
    @pl.when(ki == 0)
    def _():
        q = jnp.dot(xq_ref[...], wqt_ref[...], preferred_element_type=jnp.float32)
        q_scratch[...] = ((q + bq_ref[...]) * scale).astype(q_scratch.dtype)

    start = pl.multiple_of(ki * tk, tk)
    k_tile = k_scratch[pl.ds(start, tk), :]
    # scores = Q_scaled @ K^T, contracting the last dims directly (no k.T copy).
    scores = lax.dot_general(q_scratch[...], k_tile,
                             dimension_numbers=(((1,), (1,)), ((), ())),
                             preferred_element_type=jnp.float32)
    o_ref[...] = scores.astype(o_ref.dtype)


def _stream_kernel(xq_ref, xk_ref, wqt_ref, wkt_ref, bq_ref, bk_ref,
                   o_ref, q_scratch, *, scale):
    # Fallback path for very long S: K for the current ki tile is streamed + projected.
    ki = pl.program_id(2)

    @pl.when(ki == 0)
    def _():
        q = jnp.dot(xq_ref[...], wqt_ref[...], preferred_element_type=jnp.float32)
        q_scratch[...] = ((q + bq_ref[...]) * scale).astype(q_scratch.dtype)

    k = jnp.dot(xk_ref[...], wkt_ref[...], preferred_element_type=jnp.float32)
    k = (k + bk_ref[...]).astype(q_scratch.dtype)

    scores = lax.dot_general(q_scratch[...], k,
                             dimension_numbers=(((1,), (1,)), ((), ())),
                             preferred_element_type=jnp.float32)
    o_ref[...] = scores.astype(o_ref.dtype)


# ----------------------------------------------------------------------------- planning


def _vmem_capacity_bytes():
    try:
        return int(pltpu.get_tpu_info().vmem_capacity_bytes)
    except Exception:
        return 64 << 20  # conservative: v7x physical VMEM per TensorCore


def _plan_bytes(tq, tk, s, d, x_bytes, out_bytes, use_kcache):
    b = 2 * tq * tk * out_bytes               # double-buffered output tile
    b += 2 * tq * d * x_bytes                 # double-buffered xq tile
    if use_kcache:
        b += 2 * s * d * x_bytes              # resident full-S xk block (worst case 2 bufs)
        b += s * d * x_bytes                  # K scratch
    else:
        b += 2 * tk * d * x_bytes             # double-buffered xk tile
    b += tq * d * x_bytes                     # Q scratch
    b += 2 * d * d * x_bytes + 2 * d * 4      # weights + biases
    return b


_TILE_CANDIDATES = (2048, 1024, 512, 256, 128)


# ----------------------------------------------------------------------------- wrapper


def attention_scores(x, wq, bq, wk, bk, *, out_dtype=jnp.float32):
    """Scores of the PyTorch Attention.forward.

    x: (B, H, S, D); wq/wk: (D, D) PyTorch layout (out, in); bq/bk: (D,).
    Returns (B, H, S, S) = (x@Wq.T+bq) @ (x@Wk.T+bk).T / sqrt(D).
    """
    B, H, S, D = x.shape
    BH = B * H
    x_bytes = x.dtype.itemsize
    out_bytes = jnp.dtype(out_dtype).itemsize

    cap = _vmem_capacity_bytes()
    budget = int(0.70 * cap)
    max_tile = 2048 if cap >= (100 << 20) else 1024  # 2048 only on 128 MiB chips

    # Keep the whole projected K for one bh resident in VMEM unless it is too big.
    use_kcache = (3 * S * D * x_bytes) <= (12 << 20)

    # ---- tile selection / padding so output stores stay lane-dense -----------------
    s_pad = S
    tile = None
    for t in _TILE_CANDIDATES:
        if (t <= max_tile and S % t == 0
                and _plan_bytes(t, t, S, D, x_bytes, out_bytes, use_kcache) <= budget):
            tile = t
            break
    if tile is None:
        if S <= 512:
            tile = S  # small, non-aligned S: full-extent blocks are always legal
        else:
            s_pad = ((S + 127) // 128) * 128  # pad ragged S; slice output back below
            for t in _TILE_CANDIDATES:
                if (t <= max_tile and s_pad % t == 0
                        and _plan_bytes(t, t, s_pad, D, x_bytes, out_bytes, use_kcache) <= budget):
                    tile = t
                    break
            if tile is None:
                tile = 128

    x_flat = x.reshape(BH, S, D)
    if s_pad != S:
        x_flat = jnp.pad(x_flat, ((0, 0), (0, s_pad - S), (0, 0)))

    tq = tk = tile
    nq = s_pad // tq
    nk = s_pad // tk
    scale = 1.0 / math.sqrt(D)

    wqt = wq.T  # so x @ wqt == x @ Wq.T (nn.Linear layout)
    wkt = wk.T
    bq2 = bq.reshape(1, D).astype(jnp.float32)
    bk2 = bk.reshape(1, D).astype(jnp.float32)

    plan = _plan_bytes(tq, tk, s_pad, D, x_bytes, out_bytes, use_kcache)
    vmem_limit = int(min(max(2 * plan, 32 << 20), int(0.85 * cap)))
    vmem_limit = max(vmem_limit, min(int(1.25 * plan), cap))  # never clamp below the plan

    if use_kcache:
        kernel = functools.partial(_kcache_kernel, scale=scale, tk=tk)
        in_specs = [
            pl.BlockSpec((None, tq, D), lambda bh, qi, ki: (bh, qi, 0)),     # xq tile
            pl.BlockSpec((None, s_pad, D), lambda bh, qi, ki: (bh, 0, 0)),   # full xk per bh
            pl.BlockSpec((D, D), lambda bh, qi, ki: (0, 0)),
            pl.BlockSpec((D, D), lambda bh, qi, ki: (0, 0)),
            pl.BlockSpec((1, D), lambda bh, qi, ki: (0, 0)),
            pl.BlockSpec((1, D), lambda bh, qi, ki: (0, 0)),
        ]
        scratch_shapes = [pltpu.VMEM((tq, D), x.dtype),
                          pltpu.VMEM((s_pad, D), x.dtype)]
        # K scratch spans the (qi, ki) sweep -> keep those axes un-sharded.
        dim_sem = ("parallel", "arbitrary", "arbitrary")
    else:
        kernel = functools.partial(_stream_kernel, scale=scale)
        in_specs = [
            pl.BlockSpec((None, tq, D), lambda bh, qi, ki: (bh, qi, 0)),
            pl.BlockSpec((None, tk, D), lambda bh, qi, ki: (bh, ki, 0)),
            pl.BlockSpec((D, D), lambda bh, qi, ki: (0, 0)),
            pl.BlockSpec((D, D), lambda bh, qi, ki: (0, 0)),
            pl.BlockSpec((1, D), lambda bh, qi, ki: (0, 0)),
            pl.BlockSpec((1, D), lambda bh, qi, ki: (0, 0)),
        ]
        scratch_shapes = [pltpu.VMEM((tq, D), x.dtype)]
        dim_sem = ("parallel", "parallel", "arbitrary")

    out = pl.pallas_call(
        kernel,
        out_shape=jax.ShapeDtypeStruct((BH, s_pad, s_pad), out_dtype),
        grid_spec=pltpu.PrefetchScalarGridSpec(
            num_scalar_prefetch=0,
            grid=(BH, nq, nk),
            in_specs=in_specs,
            out_specs=pl.BlockSpec((None, tq, tk), lambda bh, qi, ki: (bh, qi, ki)),
            scratch_shapes=scratch_shapes,
        ),
        compiler_params=pltpu.CompilerParams(
            dimension_semantics=dim_sem,
            vmem_limit_bytes=vmem_limit,
        ),
    )(x_flat, x_flat, wqt, wkt, bq2, bk2)

    if s_pad != S:
        out = out[:, :S, :S]
    return out.reshape(B, H, S, S)


# ----------------------------------------------------------------------------- test


def _init_linear(key, in_features, out_features):
    # Deterministic init matching nn.Linear's default: U(-1/sqrt(in), 1/sqrt(in))
    kw, kb = jax.random.split(key)
    bound = 1.0 / math.sqrt(in_features)
    w = jax.random.uniform(kw, (out_features, in_features), jnp.float32, -bound, bound)
    b = jax.random.uniform(kb, (out_features,), jnp.float32, -bound, bound)
    return w, b


if __name__ == "__main__":
    # Module config: hidden_dim=32, n_heads=4 -> head_dim=8
    hidden_dim, n_heads = 32, 4
    head_dim = hidden_dim // n_heads
    B, S = 2, 8

    key = jax.random.PRNGKey(0)
    kx, kq, kk, kx2 = jax.random.split(key, 4)

    x = jax.random.normal(kx, (B, n_heads, S, head_dim), jnp.float32)
    wq, bq = _init_linear(kq, head_dim, head_dim)
    wk, bk = _init_linear(kk, head_dim, head_dim)

    def ref_scores(xv):
        q = xv @ wq.T + bq
        k = xv @ wk.T + bk
        return (q @ jnp.swapaxes(k, -1, -2)) / jnp.sqrt(jnp.float32(head_dim))

    # Small-shape check (full-extent blocks).
    scores = jax.block_until_ready(attention_scores(x, wq, bq, wk, bk))
    assert scores.shape == (B, n_heads, S, S)
    assert jnp.allclose(scores, ref_scores(x), atol=1e-4, rtol=1e-4)

    # Multi-tile sanity check: exercises the (qi, ki) grid and the K-scratch slicing.
    S2 = 384
    x2 = jax.random.normal(kx2, (1, n_heads, S2, head_dim), jnp.float32)
    scores2 = jax.block_until_ready(attention_scores(x2, wq, bq, wk, bk))
    assert scores2.shape == (1, n_heads, S2, S2)
    assert jnp.allclose(scores2, ref_scores(x2), atol=1e-3, rtol=1e-3)

    print("KERNEL_OK")
</pallas_src>

<mosaic_0001>
module attributes {stable_mosaic.version = 11 : i64} {
  func.func @_kcache_kernel(%arg0: i32, %arg1: i32, %arg2: i32, %arg3: memref<1x8x8xf32, #tpu.memory_space<vmem>>, %arg4: memref<1x8x8xf32, #tpu.memory_space<vmem>>, %arg5: memref<8x8xf32, #tpu.memory_space<vmem>>, %arg6: memref<8x8xf32, #tpu.memory_space<vmem>>, %arg7: memref<1x8xf32, #tpu.memory_space<vmem>>, %arg8: memref<1x8xf32, #tpu.memory_space<vmem>>, %arg9: memref<1x8x8xf32, #tpu.memory_space<vmem>>, %arg10: memref<8x8xf32, #tpu.memory_space<vmem>>, %arg11: memref<8x8xf32, #tpu.memory_space<vmem>>) attributes {dimension_semantics = [#tpu.dimension_semantics<parallel>, #tpu.dimension_semantics<arbitrary>, #tpu.dimension_semantics<arbitrary>], iteration_bounds = array<i64: 8, 1, 1>, scalar_prefetch = 0 : i64, scratch_operands = 2 : i64, tpu.core_type = #tpu.core_type<tc>, window_params = [{transform_indices = @transform_0, window_bounds = array<i64: 1, 8, 8>}, {transform_indices = @transform_1, window_bounds = array<i64: 1, 8, 8>}, {pipeline_mode = #tpu.pipeline_mode<synchronous>, transform_indices = @transform_2, window_bounds = array<i64: 8, 8>}, {pipeline_mode = #tpu.pipeline_mode<synchronous>, transform_indices = @transform_3, window_bounds = array<i64: 8, 8>}, {pipeline_mode = #tpu.pipeline_mode<synchronous>, transform_indices = @transform_4, window_bounds = array<i64: 1, 8>}, {pipeline_mode = #tpu.pipeline_mode<synchronous>, transform_indices = @transform_5, window_bounds = array<i64: 1, 8>}, {transform_indices = @transform_6, window_bounds = array<i64: 1, 8, 8>}]} {
    %c0_i32 = arith.constant 0 : i32
    %0 = arith.cmpi eq, %arg1, %c0_i32 : i32
    %c0_i32_0 = arith.constant 0 : i32
    %1 = arith.cmpi eq, %arg2, %c0_i32_0 : i32
    %2 = arith.andi %0, %1 : i1
    %3 = arith.extui %2 : i1 to i32
    %c0_i32_1 = arith.constant 0 : i32
    %4 = arith.cmpi ne, %3, %c0_i32_1 : i32
    scf.if %4 {
      %c0_9 = arith.constant 0 : index
      %c0_10 = arith.constant 0 : index
      %c0_11 = arith.constant 0 : index
      %17 = vector.load %arg4[%c0_9, %c0_10, %c0_11] : memref<1x8x8xf32, #tpu.memory_space<vmem>>, vector<1x8x8xf32>
      %18 = vector.shape_cast %17 : vector<1x8x8xf32> to vector<8x8xf32>
      %c0_12 = arith.constant 0 : index
      %c0_13 = arith.constant 0 : index
      %19 = vector.load %arg6[%c0_12, %c0_13] : memref<8x8xf32, #tpu.memory_space<vmem>>, vector<8x8xf32>
      %cst_14 = arith.constant dense<0.000000e+00> : vector<8x8xf32>
      %20 = tpu.matmul %18, %19, %cst_14 {dimension_numbers = #tpu.dot_dimension_numbers<[1], [0], [0], [1], [0, 0, 1, 1], [], []>} : vector<8x8xf32>, vector<8x8xf32>, vector<8x8xf32> -> vector<8x8xf32>
      %c0_15 = arith.constant 0 : index
      %c0_16 = arith.constant 0 : index
      %21 = vector.load %arg8[%c0_15, %c0_16] : memref<1x8xf32, #tpu.memory_space<vmem>>, vector<1x8xf32>
      %22 = vector.broadcast %21 : vector<1x8xf32> to vector<8x8xf32>
      %23 = arith.addf %20, %22 : vector<8x8xf32>
      %c0_17 = arith.constant 0 : index
      %c0_18 = arith.constant 0 : index
      %24 = vector.load %arg11[%c0_17, %c0_18] : memref<8x8xf32, #tpu.memory_space<vmem>>, vector<8x8xf32>
      tpu.vector_store %arg11[%c0_17, %c0_18], %23 {strides = array<i32>} : memref<8x8xf32, #tpu.memory_space<vmem>>, vector<8x8xf32>,
    } else {
    }
    %c0_i32_2 = arith.constant 0 : i32
    %5 = arith.cmpi eq, %arg2, %c0_i32_2 : i32
    %6 = arith.extui %5 : i1 to i32
    %c0_i32_3 = arith.constant 0 : i32
    %7 = arith.cmpi ne, %6, %c0_i32_3 : i32
    scf.if %7 {
      %c0_9 = arith.constant 0 : index
      %c0_10 = arith.constant 0 : index
      %c0_11 = arith.constant 0 : index
      %17 = vector.load %arg3[%c0_9, %c0_10, %c0_11] : memref<1x8x8xf32, #tpu.memory_space<vmem>>, vector<1x8x8xf32>
      %18 = vector.shape_cast %17 : vector<1x8x8xf32> to vector<8x8xf32>
      %c0_12 = arith.constant 0 : index
      %c0_13 = arith.constant 0 : index
      %19 = vector.load %arg5[%c0_12, %c0_13] : memref<8x8xf32, #tpu.memory_space<vmem>>, vector<8x8xf32>
      %cst_14 = arith.constant dense<0.000000e+00> : vector<8x8xf32>
      %20 = tpu.matmul %18, %19, %cst_14 {dimension_numbers = #tpu.dot_dimension_numbers<[1], [0], [0], [1], [0, 0, 1, 1], [], []>} : vector<8x8xf32>, vector<8x8xf32>, vector<8x8xf32> -> vector<8x8xf32>
      %c0_15 = arith.constant 0 : index
      %c0_16 = arith.constant 0 : index
      %21 = vector.load %arg7[%c0_15, %c0_16] : memref<1x8xf32, #tpu.memory_space<vmem>>, vector<1x8xf32>
      %22 = vector.broadcast %21 : vector<1x8xf32> to vector<8x8xf32>
      %23 = arith.addf %20, %22 : vector<8x8xf32>
      %cst_17 = arith.constant 0.353553385 : f32
      %24 = vector.broadcast %cst_17 : f32 to vector<8x8xf32>
      %25 = arith.mulf %23, %24 : vector<8x8xf32>
      %c0_18 = arith.constant 0 : index
      %c0_19 = arith.constant 0 : index
      %26 = vector.load %arg10[%c0_18, %c0_19] : memref<8x8xf32, #tpu.memory_space<vmem>>, vector<8x8xf32>
      tpu.vector_store %arg10[%c0_18, %c0_19], %25 {strides = array<i32>} : memref<8x8xf32, #tpu.memory_space<vmem>>, vector<8x8xf32>,
    } else {
    }
    %c8_i32 = arith.constant 8 : i32
    %8 = arith.muli %arg2, %c8_i32 : i32
    %9 = tpu.assume_multiple %8, 8 : i32
    %10 = arith.index_cast %9 : i32 to index
    %c0 = arith.constant 0 : index
    %11 = vector.load %arg11[%10, %c0] : memref<8x8xf32, #tpu.memory_space<vmem>>, vector<8x8xf32>
    %c0_4 = arith.constant 0 : index
    %c0_5 = arith.constant 0 : index
    %12 = vector.load %arg10[%c0_4, %c0_5] : memref<8x8xf32, #tpu.memory_space<vmem>>, vector<8x8xf32>
    %cst = arith.constant dense<0.000000e+00> : vector<8x8xf32>
    %13 = tpu.matmul %12, %11, %cst {dimension_numbers = #tpu.dot_dimension_numbers<[1], [1], [0], [0], [0, 0, 1, 0], [], []>} : vector<8x8xf32>, vector<8x8xf32>, vector<8x8xf32> -> vector<8x8xf32>
    %c0_6 = arith.constant 0 : index
    %c0_7 = arith.constant 0 : index
    %c0_8 = arith.constant 0 : index
    %14 = vector.load %arg9[%c0_6, %c0_7, %c0_8] : memref<1x8x8xf32, #tpu.memory_space<vmem>>, vector<1x8x8xf32>
    %15 = vector.shape_cast %14 : vector<1x8x8xf32> to vector<8x8xf32>
    %16 = vector.shape_cast %13 : vector<8x8xf32> to vector<1x8x8xf32>
    tpu.vector_store %arg9[%c0_6, %c0_7, %c0_8], %16 {strides = array<i32>} : memref<1x8x8xf32, #tpu.memory_space<vmem>>, vector<1x8x8xf32>,
    return
  }
  func.func @transform_0(%arg0: i32, %arg1: i32, %arg2: i32) -> (i32, i32, i32) {
    %c0_i32 = arith.constant 0 : i32
    %c0_i32_0 = arith.constant 0 : i32
    return %arg0, %arg1, %c0_i32 : i32, i32, i32
  }
  func.func @transform_1(%arg0: i32, %arg1: i32, %arg2: i32) -> (i32, i32, i32) {
    %c0_i32 = arith.constant 0 : i32
    %c0_i32_0 = arith.constant 0 : i32
    %c0_i32_1 = arith.constant 0 : i32
    return %arg0, %c0_i32, %c0_i32_0 : i32, i32, i32
  }
  func.func @transform_2(%arg0: i32, %arg1: i32, %arg2: i32) -> (i32, i32) {
    %c0_i32 = arith.constant 0 : i32
    %c0_i32_0 = arith.constant 0 : i32
    %c0_i32_1 = arith.constant 0 : i32
    return %c0_i32, %c0_i32_0 : i32, i32
  }
  func.func @transform_3(%arg0: i32, %arg1: i32, %arg2: i32) -> (i32, i32) {
    %c0_i32 = arith.constant 0 : i32
    %c0_i32_0 = arith.constant 0 : i32
    %c0_i32_1 = arith.constant 0 : i32
    return %c0_i32, %c0_i32_0 : i32, i32
  }
  func.func @transform_4(%arg0: i32, %arg1: i32, %arg2: i32) -> (i32, i32) {
    %c0_i32 = arith.constant 0 : i32
    %c0_i32_0 = arith.constant 0 : i32
    %c0_i32_1 = arith.constant 0 : i32
    return %c0_i32, %c0_i32_0 : i32, i32
  }
  func.func @transform_5(%arg0: i32, %arg1: i32, %arg2: i32) -> (i32, i32) {
    %c0_i32 = arith.constant 0 : i32
    %c0_i32_0 = arith.constant 0 : i32
    %c0_i32_1 = arith.constant 0 : i32
    return %c0_i32, %c0_i32_0 : i32, i32
  }
  func.func @transform_6(%arg0: i32, %arg1: i32, %arg2: i32) -> (i32, i32, i32) {
    %c0_i32 = arith.constant 0 : i32
    return %arg0, %arg1, %arg2 : i32, i32, i32
  }
}

</mosaic_0001>

<bundles_post_ra>
// kernel: tpu_custom_call.1
= control target key start
LH: loop header
LB: loop body
LE: loop exit
PB: predicated region body
PF: predicated region fallthrough
CT: control target
= control target key end

     0   :  { %s1159_s0 = inlined_call_operand.hbm [shape: f32[8,8,8], index: 0, kind: input, shape index: {}]   ;;  %s1160_s1 = inlined_call_operand.hbm [shape: f32[8,8,8], index: 1, kind: input, shape index: {}]   ;;  %s1161_s2 = inlined_call_operand.hbm [shape: f32[8,8], index: 2, kind: input, shape index: {}]   ;;  %s1162_s3 = inlined_call_operand.hbm [shape: f32[8,8], index: 3, kind: input, shape index: {}]   ;;  %s1163_s4 = inlined_call_operand.vmem [shape: f32[1,8], index: 4, kind: input, shape index: {}]   ;;  %s1164_s5 = inlined_call_operand.vmem [shape: f32[1,8], index: 5, kind: input, shape index: {}]   ;;  %s1165_s6 = inlined_call_operand.hbm [shape: f32[8,8,8], index: 6, kind: output, shape index: {}]  }
   0x1   :  { %1170 = sst [smem:[#allocation23_spill]] %s1161_s2 }
   0x2   :  { %1171 = sst [smem:[#allocation24_spill]] %s1162_s3 }
   0x3   :  { %11 = vsyncpa [#allocation5], 0 }
   0x4   :  { %13 = vsyncpa [#allocation5 + $0x1], 0 }
   0x5   :  { %14 = vsyncpa [#allocation8], 0 }
   0x6   :  { %16 = vsyncpa [#allocation8 + $0x1], 0 }
   0x7   :  { %17 = vsyncpa [#allocation11], 0 }
   0x8   :  { %18 = vsyncpa [#allocation6], 0 }
   0x9   :  { %20 = vsyncpa [#allocation6 + $0x1], 0  ;;  %s980_s21 = smov 0   ;;  %s982_s22 = smov 0  }
   0xa   :  { %s984_s23 = smov 0   ;;  %s986_s24 = smov 0  }
   0xb   :  { %s988_s25 = smov 0   ;;  %s990_s26 = smov 0  }
   0xc LB: > { %1172 = sst [smem:[#allocation18_spill]] %s929_s23  ;;  %s1011_s27 = sadd.s32 4294967295, %s941_s26   ;;  %s941_s26 = sphi %s990_s26, %s26_s26   ;;  %s937_s25 = sphi %s988_s25, %s1188_s25   ;;  %s933_s24 = sphi %s986_s24, %s1187_s24   ;;  %s929_s23 = sphi %s984_s23, %s1186_s23   ;;  %s925_s22 = sphi %s982_s22, %s1190_s22   ;;  %s921_s21 = sphi %s980_s21, %s1189_s21  }
   0xd   : > { %1173 = sst [smem:[#allocation19_spill]] %s937_s25  ;;  %s614_s28 = sadd.s32 4294967294, %s941_s26  }
   0xe   : > { %p67_p0 = scmp.ne.s32.totalorder %s925_s22, %s921_s21  ;;  %p68_p1 = scmp.eq.s32.totalorder %s1011_s27, 0 }
   0xf   : > { %p205_p2 = scmp.eq.s32.totalorder %s1011_s27, 7  ;;  %p211_p3 = scmp.eq.s32.totalorder %s614_s28, 7 }
  0x10   : > { %p1020_p4 = por %p68_p1, %p67_p0  ;;  %p615_p5 = scmp.ge.s32.totalorder %s941_s26, 1 }
  0x11   : > { %p1025_p6 = por %p211_p3, %p67_p0  ;;  %p218_p7 = scmp.lt.s32.totalorder %s941_s26, 9 }
  0x12   : > { %s1177_s2 = sld [smem:[#allocation23_spill]]  ;;  %s943_s11 = smov [#allocation9]  }
  0x13   : > { %s1175_s30 = scalar_select %p1025_p6, 1, 0 }
  0x14   : > { %p1033_p8 = pnand %p615_p5, %p218_p7  ;;  %s232_s12 = sshll.u32 %s943_s11, 4  ;;  %s233_s12 = int_to_ptr.vmem [resolvable:$true] %s232_s12 }
  0x15   : > { %1176 = sst [smem:[#allocation20_spill]] %s1175_s30  ;;  %s944_s16 = smov [#allocation10]  }
  0x16   : > { %p651_p9 = pneg %p1033_p8  ;;  %s1179_s3 = sld [smem:[#allocation24_spill]] }
  0x17   : > { %s244_s17 = sshll.u32 %s944_s16, 4  ;;  %s45_s18 = sadd.s32 1, %s937_s25  ;;  %s245_s17 = int_to_ptr.vmem [resolvable:$true] %s244_s17 }
  0x18   : > { %s230_s9 = sshll.u32 %s1177_s2, 4  ;;  %p652_p10 = pnand %p651_p9, %p68_p1  ;;  %s231_s9 = int_to_ptr.hbm [resolvable:$true] %s230_s9 }
  0x19   : > { %s54_s19 = sadd.s32 1, %s929_s23  ;;  %p47_p11 = scmp.ge.s32.totalorder %s45_s18, 8 }
  0x1a   : > { %654 = dma.hbm_to_vmem [thread:$0]  (!%p652_p10), %s231_s9, 128, %s233_s12, [#allocation8]  }
  0x1b   : > { %p61_p12 = scmp.ne.s32.totalorder %s929_s23, %s925_s22  ;;  %p62_p13 = scmp.eq.s32.totalorder %s941_s26, 0 }
  0x1c   : > { %s242_s15 = sshll.u32 %s1179_s3, 4  ;;  %p671_p0 = scmp.lt.s32.totalorder %s941_s26, 8  ;;  %s243_s15 = int_to_ptr.hbm [resolvable:$true] %s242_s15 }
  0x1d   : > { %657 = dma.hbm_to_vmem [thread:$0]  (!%p652_p10), %s243_s15, 128, %s245_s17, [#allocation11]  }
  0x1e   : > { %s1192_s18 = smov (%p47_p11, %s45_s18), 0  ;;  %p1052_p3 = por %p62_p13, %p61_p12 }
  0x1f   : > { %1180 = sst [smem:[#allocation21_spill]] %s1192_s18  ;;  %p1058_p5 = por %p205_p2, %p61_p12 }
  0x20   : > { %s49_s7 = ssub.s32 %s937_s25, %s1192_s18  ;;  %s261_s8 = sand.u32 1, %s929_s23  }
  0x21   : > { %p52_p7 = scmp.eq.s32.totalorder %s49_s7, 0  ;;  %s619_s9 = sshll.u32 %s261_s8, 3 }
  0x22   : > { %s620_s11 = sshll.u32 %s937_s25, 3  ;;  %s265_s17 = scalar_lea.vmem [#allocation4], %s619_s9 }
  0x23   : > { %s1067_s12 = scalar_select %p52_p7, %s929_s23, %s54_s19  }
  0x24   : > { %s270_s15 = scalar_lea.hbm %s1159_s0, %s620_s11  ;;  %s274_s2 = sshll.u32 %s265_s17, 4  ;;  %s275_s2 = int_to_ptr.vmem [resolvable:$true] %s274_s2 }
  0x25   : > { %1183 = sst [smem:[#allocation22_spill]] %s1067_s12  ;;  %s272_s16 = sshll.u32 %s270_s15, 4  ;;  %s273_s16 = int_to_ptr.hbm [resolvable:$true] %s272_s16 }
  0x26   : > { %p659_p2 = pnand %p671_p0, %p1052_p3  ;;  %s289_s7 = scalar_lea.hbm %s1160_s1, %s620_s11 }
  0x27   : > { %s281_s30 = sand.u32 1, %s941_s26   ;;  %s262_s25 = scalar_lea.sflag [#allocation5], %s261_s8 }
  0x28   : > { %661 = dma.hbm_to_vmem [thread:$0]  (!%p659_p2), %s273_s16, 128, %s275_s2, %s262_s25  }
  0x29   : > { %s291_s19 = sshll.u32 %s289_s7, 4  ;;  %s285_s12 = scalar_lea.vmem [#allocation7], %s619_s9  ;;  %s292_s19 = int_to_ptr.hbm [resolvable:$true] %s291_s19 }
  0x2a   : > { %s293_s23 = sshll.u32 %s285_s12, 4  ;;  %s282_s13 = scalar_lea.sflag [#allocation8], %s281_s30  ;;  %s294_s23 = int_to_ptr.vmem [resolvable:$true] %s293_s23 }
  0x2b   : > { %664 = dma.hbm_to_vmem [thread:$0]  (!%p659_p2), %s292_s19, 128, %s294_s23, %s282_s13  }
  0x2c   : > { %302 = sbr.rel (%p1033_p8) target bundleno = 333 (0x14d), region = 44  ;;  %s1083_s20 = sand.u32 (!%p1033_p8), 1, %s925_s22  }
  0x2d   : > { %s1086_s3 = sshll.u32 (!%p1033_p8), %s1083_s20, 3  ;;  %s305_s2 = scalar_lea.sflag (!%p1033_p8), [#allocation5], %s1083_s20 }
  0x2e   : > { %s308_s25 = scalar_lea.vmem (!%p1033_p8), [#allocation4], %s1086_s3 }
  0x31   : > { %900 = dma.done.wait (%p1020_p4), %s305_s2, 128  }
  0x32   : > { %902 = vsyncadd (%p1020_p4), %s305_s2, 4294967168  ;;  %s314_s23 = sand.u32 1, %s1011_s27   ;;  %s318_s10 = scalar_lea.vmem [#allocation7], %s1086_s3 }
  0x33   : > { %s315_s30 = scalar_lea.sflag [#allocation8], %s314_s23 }
  0x34   : > { %904 = dma.done.wait (%p1020_p4), %s315_s30, 128  }
  0x35   : > { %906 = vsyncadd (%p1020_p4), %s315_s30, 4294967168 }
  0x36   : > { %908 = dma.done.wait (%p68_p1), [#allocation8], 128  }
  0x37   : > { %910 = vsyncadd (%p68_p1), [#allocation8], 4294967168 }
  0x38   : > { %912 = dma.done.wait (%p68_p1), [#allocation11], 128  }
  0x39   : > { %914 = vsyncadd (%p68_p1), [#allocation11], 4294967168  ;;  %vm375_vm0 = vcmask 64512   ;;  %v370_v0 = vld [vmem:[#allocation10] sm:$0xff]  ;;  %v369_v1 = vld [vmem:[%s318_s10] sm:$0xff]  ;;  %s634_s9 = sshll.u32 %s933_s24, 3 }
  0x3a   : > { %v404_v2 = vld [vmem:[#allocation9] sm:$0xff]  ;;  %394 = vmatpush.msra.mxu0 %v370_v0  ;;  %v725_v4 = vld [vmem:[%s1164_s5] ss:$0 sm:$0xff]  ;;  %s480_s14 = scalar_lea.hbm %s1165_s6, %s634_s9  ;;  %s362_s15 = scalar_lea.vmem [#allocation12], %s1086_s3 }
  0x3b   : > { %428 = vmatpush.msra.mxu1 %v404_v2  ;;  %v403_v3 = vld [vmem:[%s308_s25] sm:$0xff]  ;;  %629 = vmatmul.msk.f32.vlgmr.msra.gmra.mxu0 %vm375_vm0, %v369_v1  ;;  %v726_v5 = vld [vmem:[%s1163_s4] ss:$0 sm:$0xff]  ;;  %s482_s16 = sshll.u32 %s362_s15, 4  ;;  %s484_s17 = sshll.u32 %s480_s14, 4  ;;  %s483_s16 = int_to_ptr.vmem [resolvable:$true] %s482_s16  ;;  %s485_s17 = int_to_ptr.hbm [resolvable:$true] %s484_s17 }
  0x3c   : > { %630 = vmatmul.msk.f32.vlgmr.msra.gmra.mxu1 %vm375_vm0, %v403_v3  ;;  %s468_s7 = scalar_lea.sflag [#allocation6], %s1083_s20  ;;  %s861_s19 = sshra.s32 %s485_s17, 4  ;;  %s862_s19 = int_to_ptr.hbm [resolvable:$true] %s861_s19 }
  0x3d   : > { %s863_s13 = scalar_lea.hbm %s862_s19, 8  ;;  %s867_s25 = scalar_lea.hbm %s1165_s6, 64 }
  0x3e   : > { %p864_p1 = scmp.ne.s32.totalorder %s862_s19, %s863_s13  ;;  %p868_p9 = scmp.lt.s32.totalorder %s862_s19, %s1165_s6 }
  0x3f   : > { %p869_p10 = scmp.lt.s32.totalorder %s867_s25, %s863_s13 }
  0x40   : > { %p865_p4 = pnand %p864_p1, %p1058_p5 }
  0x41   : > { %p870_p11 = por %p869_p10, %p868_p9 }
  0x42   : > { %p866_p8 = pneg %p865_p4 }
  0x44   : > { %p871_p12 = pnand %p870_p11, %p866_p8 }
  0xb8   : > { %v396_v6 = vpop.f32.mrf.mxu0 }
  0xb9   : > { %v430_v7 = vpop.f32.mrf.mxu1  ;;  %v397_v8 = vadd.f32 %v725_v4, %v396_v6 }
  0xba   : > { %v431_v9 = vadd.f32 %v726_v5, %v430_v7 }
  0xbb   : > { %399 = vst.msk [vmem:[#allocation3] sm:$0xff] %vm375_vm0, %v397_v8 }
  0xbc   : > { %v433_v10 = vmul.f32 0.35355338, %v431_v9 }
  0xbe   : > { %434 = vst.msk [vmem:[#allocation2] sm:$0xff] %vm375_vm0, %v433_v10 }
  0xc2   : > { %v437_v11 = vld [vmem:[#allocation3] sm:$0xff] }
  0xc3   : > { %631 = vmatpush.xpose.msk.msra.mxu2 %vm375_vm0, %v437_v11 }
  0xc5   : > { %v438_v12 = vld [vmem:[#allocation2] sm:$0xff] }
  0xc6   : > { %632 = vmatmul.msk.f32.vlgmr.msra.gmra.mxu2 %vm375_vm0, %v438_v12 }
 0x149   : > { %v463_v13 = vpop.f32.mrf.mxu2 }
 0x14a   : > { %466 = vst.msk [vmem:[%s362_s15] sm:$0xff] %vm375_vm0, %v463_v13 }
 0x14b   : > { %874 = shalt.err (!%p871_p12)
}
 0x14c   : > { %649 = dma.vmem_to_hbm [thread:$0]  (%p1058_p5), %s483_s16, 128, %s485_s17, %s468_s7  }
 0x14d PF: > { %p674_p13 = scmp.ge.s32.totalorder %s941_s26, 2  ;;  %s496_s30 = sand.u32 1, %s921_s21  }
 0x14e   : > { %s497_s10 = scalar_lea.sflag [#allocation6], %s496_s30 }
 0x14f   : > { %p666_p0 = pnand %p674_p13, %p1025_p6 }
 0x151   : > { %p667_p3 = pneg %p666_p0 }
 0x153   : > { %916 = dma.done.wait (%p667_p3), %s497_s10, 128  }
 0x154   : > { %918 = vsyncadd (%p667_p3), %s497_s10, 4294967168  ;;  %s26_s26 = sadd.s32 1, %s941_s26   ;;  %s1185_s29 = sld [smem:[#allocation18_spill]] }
 0x155   : > { %p23_p7 = scmp.ge.s32.totalorder %s26_s26, 10   ;;  %s1186_s23 = sld [smem:[#allocation22_spill]] }
 0x156   : > { %s1187_s24 = sld [smem:[#allocation19_spill]]  ;;  %s1189_s21 = smov %s925_s22 }
 0x157   : > { %s1188_s25 = sld [smem:[#allocation21_spill]]  ;;  %25 = sbr.rel (!%p23_p7) target bundleno = 12 (0xc), region = 119 }
 0x15a   : > { %s1190_s22 = smov %s1185_s29 }
 0x15c   :  { %503 = vsyncpa [#allocation5], 1 }
 0x15d   :  { %505 = vsyncpa [#allocation5 + $0x1], 1 }
 0x15e   :  { %506 = vsyncpa [#allocation8], 1 }
 0x15f   :  { %508 = vsyncpa [#allocation8 + $0x1], 1 }
 0x160   :  { %509 = vsyncpa [#allocation11], 1 }
 0x161   :  { %510 = vsyncpa [#allocation6], 1 }
 0x162   :  { %512 = vsyncpa [#allocation6 + $0x1], 1 }

</bundles_post_ra>
